<compile_context>
chip_gen: v5e
topology: v5e:2x2
jax: 0.10.0
libtpu: 0.0.40
codegen_flags: <defaults>
</compile_context>

<pallas_src>
import jax
import jax.numpy as jnp
from jax.experimental import pallas as pl
from jax.experimental.pallas import tpu as pltpu


def _round_up(x, m):
    return (x + m - 1) // m * m


def _classif_bil_sym_kernel(x_ref, w2_ref, q_ref, dg_ref, b0_ref, o_ref):
    # x_ref  : (TB, 2D)          input dtype (pair-interleaved rows of X)
    # w2_ref : (2D, 2*R*C_pad)   input dtype (zero-interleaved, rank-fused RHS)
    # q_ref  : (1, R*C_pad)      f32, q[r,c] = W[c,r]·bias_vecto[c]
    # dg_ref : (1, R*C_pad)      f32, diag transposed/padded
    # b0_ref : (1, C_pad)        f32
    # o_ref  : (TB, C_pad)       f32 (lane-dense, padding sliced off outside)
    rc = q_ref.shape[-1]          # R * C_pad
    cpad = o_ref.shape[-1]        # C_pad
    r_count = rc // cpad          # R

    # Single MXU call per tile: both halves and all ranks in one RHS.
    y = jnp.dot(x_ref[...], w2_ref[...],
                preferred_element_type=jnp.float32)      # (TB, 2*R*C_pad) f32

    y0 = y[:, :rc] - q_ref[...]                          # half 0, all ranks
    y1 = y[:, rc:] - q_ref[...]                          # half 1, all ranks
    z = dg_ref[...] * (y0 * y1)                          # (TB, R*C_pad)

    # Rank reduction via cheap 128-aligned lane slices (no relayout).
    acc = z[:, :cpad]
    for r in range(1, r_count):
        acc = acc + z[:, r * cpad:(r + 1) * cpad]
    o_ref[...] = (acc + b0_ref[...]).astype(o_ref.dtype)


def _vmem_capacity_bytes():
    """Physical VMEM per TensorCore; conservative fallback (v7x = 64 MiB)."""
    try:
        return int(pltpu.get_tpu_info().vmem_capacity_bytes)
    except Exception:
        return 64 * 1024 * 1024


def _pick_tile_b(b_pad, d, c_pad, r, bpe_x, bpe_w, vmem_cap):
    """Largest batch tile (multiple of 8, divisor of b_pad) fitting ~50% VMEM,
    with padding-aware byte accounting and a >=2-grid-step cap for dual-TC."""
    budget = vmem_cap // 2
    rc = r * c_pad
    # Grid-invariant operands (double-buffered by the default pipeline).
    const_bytes = 2 * (_round_up(2 * d, 8) * 2 * rc * bpe_w   # W2
                       + 2 * 8 * rc * 4                       # q, dg (8-sublane pad)
                       + 8 * c_pad * 4)                       # bias0
    lane_x = _round_up(2 * d, 128)
    per_row = (2 * lane_x * bpe_x          # x block (double-buffered)
               + 2 * c_pad * 4             # out block (double-buffered)
               + 6 * rc * 4)               # y / y0 / y1 / z f32 intermediates
    avail = max(budget - const_bytes, per_row * 8)
    cap = max(8, avail // per_row)
    cap = min(cap, 512)                    # vreg / scratch pressure ceiling
    if b_pad >= 16:                        # keep >=2 grid steps (v7x dual TC)
        cap = min(cap, max(8, (b_pad // 2) // 8 * 8))
    cap = min(cap, b_pad)
    best = 8
    t = 8
    while t <= cap:
        if b_pad % t == 0:
            best = t
        t += 8
    return best


def classif_bil_sym_2(X, weight, diag, bias_vecto, bias0, *, tile_b=None):
    """Pallas TPU forward of torchmodule_Classif_Bil_Sym_2.

    X          : (B, dim, 2)
    weight     : (nb_classes, rang, dim)
    diag       : (nb_classes, rang)
    bias_vecto : (nb_classes, dim)
    bias0      : (nb_classes,)
    returns    : (B, nb_classes) float32
    """
    B, D, two = X.shape
    assert two == 2, "forward() reads X[..., 0] and X[..., 1]"
    C, R, Dw = weight.shape
    assert Dw == D

    C_pad = _round_up(C, 128)          # lane-dense output / weight columns
    RC = R * C_pad

    # ---- wrapper-side layout plumbing (all grid-invariant / free) ----------
    # X (B, D, 2) -> (B, 2D): free contiguous reshape, no HBM transpose pass.
    x2 = X.reshape(B, 2 * D)
    B_pad = _round_up(B, 8)
    if B_pad != B:
        x2 = jnp.pad(x2, ((0, B_pad - B), (0, 0)))

    # Zero-interleaved, rank-fused RHS:
    #   W2[2d + h, h*RC + r*C_pad + c] = weight[c, r, d]; zeros elsewhere.
    wdc = jnp.transpose(weight, (2, 1, 0))                       # (D, R, C)
    if C_pad != C:
        wdc = jnp.pad(wdc, ((0, 0), (0, 0), (0, C_pad - C)))
    w2 = jnp.zeros((D, 2, 2, R, C_pad), wdc.dtype)
    w2 = w2.at[:, 0, 0].set(wdc).at[:, 1, 1].set(wdc)
    w2 = w2.reshape(2 * D, 2 * RC)                               # keep native dtype

    # q[r,c] = W[c,r]·bias_vecto[c]  (hoisted; f32 for the elementwise tail)
    q = jnp.einsum('crd,cd->rc',
                   weight.astype(jnp.float32),
                   bias_vecto.astype(jnp.float32))               # (R, C)
    q = jnp.pad(q, ((0, 0), (0, C_pad - C))).reshape(1, RC)
    dg = jnp.pad(diag.astype(jnp.float32).T,
                 ((0, 0), (0, C_pad - C))).reshape(1, RC)
    b0 = jnp.pad(bias0.astype(jnp.float32), (0, C_pad - C)).reshape(1, C_pad)

    # ---- tiling / VMEM budgeting -------------------------------------------
    vmem_cap = _vmem_capacity_bytes()
    vmem_limit = min(int(vmem_cap * 3 // 4), 100 * 1024 * 1024)
    bpe_x = jnp.dtype(x2.dtype).itemsize
    bpe_w = jnp.dtype(w2.dtype).itemsize
    if tile_b is None:
        tile_b = _pick_tile_b(B_pad, D, C_pad, R, bpe_x, bpe_w, vmem_cap)
    assert B_pad % tile_b == 0 and tile_b % 8 == 0
    grid = (B_pad // tile_b,)

    cost = pl.CostEstimate(
        flops=int(2 * B_pad * (2 * D) * (2 * RC)),
        transcendentals=0,
        bytes_accessed=int(x2.size * bpe_x + w2.size * bpe_w
                           + (q.size + dg.size + b0.size) * 4
                           + B_pad * C_pad * 4),
    )

    out = pl.pallas_call(
        _classif_bil_sym_kernel,
        out_shape=jax.ShapeDtypeStruct((B_pad, C_pad), jnp.float32),
        grid_spec=pltpu.PrefetchScalarGridSpec(
            num_scalar_prefetch=0,
            grid=grid,
            in_specs=[
                pl.BlockSpec((tile_b, 2 * D), lambda i: (i, 0)),   # X (interleaved)
                pl.BlockSpec((2 * D, 2 * RC), lambda i: (0, 0)),   # W2 (rank-fused)
                pl.BlockSpec((1, RC), lambda i: (0, 0)),           # q
                pl.BlockSpec((1, RC), lambda i: (0, 0)),           # diag^T
                pl.BlockSpec((1, C_pad), lambda i: (0, 0)),        # bias0
            ],
            out_specs=pl.BlockSpec((tile_b, C_pad), lambda i: (i, 0)),
        ),
        compiler_params=pltpu.CompilerParams(
            dimension_semantics=("parallel",),
            vmem_limit_bytes=vmem_limit),
        cost_estimate=cost,
    )(x2, w2, q, dg, b0)

    return out[:B, :C]


def _reference(X, weight, diag, bias_vecto, bias0):
    """Pure-JAX mirror of the PyTorch forward (for verification)."""
    Xe = X[:, None, :, :]                      # (B, 1, D, 2)
    Bv = bias_vecto[None, :, :, None]          # (1, C, D, 1)
    Xb = Xe - Bv                               # (B, C, D, 2)
    M = weight[None]                           # (1, C, R, D)
    Y = jnp.matmul(M, Xb)                      # (B, C, R, 2)
    Y0 = Y[..., 0] * diag[None]
    Y1 = Y[..., 1]
    return (Y0 * Y1).sum(axis=-1) + bias0[None]


if __name__ == "__main__":
    key = jax.random.PRNGKey(0)
    k1, k2, k3, k4, k5, k6 = jax.random.split(key, 6)

    B, D, C, R = 16, 32, 8, 2   # batch, dim, nb_classes, rang

    X = jax.random.normal(k1, (B, D, 2), jnp.float32)
    # Deterministic xavier-normal-style initialization (shapes from __init__).
    std_w = (2.0 / (R * D + C * D)) ** 0.5
    weight = std_w * jax.random.normal(k2, (C, R, D), jnp.float32)
    std_d = (2.0 / (C + R)) ** 0.5
    diag = std_d * jax.random.normal(k3, (C, R), jnp.float32)
    std_b = (2.0 / (C + D)) ** 0.5
    bias_vecto = std_b * jax.random.normal(k4, (C, D), jnp.float32)
    bias0 = jax.random.normal(k5, (C,), jnp.float32)

    # 1) Small shape (auto tile: 8 rows -> 2 grid steps).
    out = jax.block_until_ready(
        classif_bil_sym_2(X, weight, diag, bias_vecto, bias0))
    ref = _reference(X, weight, diag, bias_vecto, bias0)
    assert out.shape == (B, C)
    assert jnp.allclose(out, ref, atol=1e-4, rtol=1e-4), (out, ref)

    # 2) Batch not a multiple of 8 -> exercises the pad/slice path and a
    #    multi-step pipelined grid.
    B2 = 50
    X2 = jax.random.normal(k6, (B2, D, 2), jnp.float32)
    out2 = jax.block_until_ready(
        classif_bil_sym_2(X2, weight, diag, bias_vecto, bias0))
    ref2 = _reference(X2, weight, diag, bias_vecto, bias0)
    assert out2.shape == (B2, C)
    assert jnp.allclose(out2, ref2, atol=1e-4, rtol=1e-4), (out2, ref2)

    print("KERNEL_OK")
</pallas_src>

<mosaic_0001>
module attributes {stable_mosaic.version = 11 : i64} {
  func.func @_classif_bil_sym_kernel(%arg0: i32, %arg1: memref<8x64xf32, #tpu.memory_space<vmem>>, %arg2: memref<64x512xf32, #tpu.memory_space<vmem>>, %arg3: memref<1x256xf32, #tpu.memory_space<vmem>>, %arg4: memref<1x256xf32, #tpu.memory_space<vmem>>, %arg5: memref<1x128xf32, #tpu.memory_space<vmem>>, %arg6: memref<8x128xf32, #tpu.memory_space<vmem>>) attributes {dimension_semantics = [#tpu.dimension_semantics<parallel>], iteration_bounds = array<i64: 2>, scalar_prefetch = 0 : i64, scratch_operands = 0 : i64, tpu.core_type = #tpu.core_type<tc>, window_params = [{transform_indices = @transform_0, window_bounds = array<i64: 8, 64>}, {pipeline_mode = #tpu.pipeline_mode<synchronous>, transform_indices = @transform_1, window_bounds = array<i64: 64, 512>}, {pipeline_mode = #tpu.pipeline_mode<synchronous>, transform_indices = @transform_2, window_bounds = array<i64: 1, 256>}, {pipeline_mode = #tpu.pipeline_mode<synchronous>, transform_indices = @transform_3, window_bounds = array<i64: 1, 256>}, {pipeline_mode = #tpu.pipeline_mode<synchronous>, transform_indices = @transform_4, window_bounds = array<i64: 1, 128>}, {transform_indices = @transform_5, window_bounds = array<i64: 8, 128>}]} {
    %c0 = arith.constant 0 : index
    %c0_0 = arith.constant 0 : index
    %0 = vector.load %arg1[%c0, %c0_0] : memref<8x64xf32, #tpu.memory_space<vmem>>, vector<8x64xf32>
    %c0_1 = arith.constant 0 : index
    %c0_2 = arith.constant 0 : index
    %1 = vector.load %arg2[%c0_1, %c0_2] : memref<64x512xf32, #tpu.memory_space<vmem>>, vector<64x512xf32>
    %cst = arith.constant dense<0.000000e+00> : vector<8x512xf32>
    %2 = tpu.matmul %0, %1, %cst {dimension_numbers = #tpu.dot_dimension_numbers<[1], [0], [0], [1], [0, 0, 1, 1], [], []>} : vector<8x64xf32>, vector<64x512xf32>, vector<8x512xf32> -> vector<8x512xf32>
    %3 = vector.extract_strided_slice %2 {offsets = [0, 0], sizes = [8, 256], strides = [1, 1]} : vector<8x512xf32> to vector<8x256xf32>
    %c0_3 = arith.constant 0 : index
    %c0_4 = arith.constant 0 : index
    %4 = vector.load %arg3[%c0_3, %c0_4] : memref<1x256xf32, #tpu.memory_space<vmem>>, vector<1x256xf32>
    %5 = vector.broadcast %4 : vector<1x256xf32> to vector<8x256xf32>
    %6 = arith.subf %3, %5 : vector<8x256xf32>
    %7 = vector.extract_strided_slice %2 {offsets = [0, 256], sizes = [8, 256], strides = [1, 1]} : vector<8x512xf32> to vector<8x256xf32>
    %c0_5 = arith.constant 0 : index
    %c0_6 = arith.constant 0 : index
    %8 = vector.load %arg3[%c0_5, %c0_6] : memref<1x256xf32, #tpu.memory_space<vmem>>, vector<1x256xf32>
    %9 = vector.broadcast %8 : vector<1x256xf32> to vector<8x256xf32>
    %10 = arith.subf %7, %9 : vector<8x256xf32>
    %c0_7 = arith.constant 0 : index
    %c0_8 = arith.constant 0 : index
    %11 = vector.load %arg4[%c0_7, %c0_8] : memref<1x256xf32, #tpu.memory_space<vmem>>, vector<1x256xf32>
    %12 = arith.mulf %6, %10 : vector<8x256xf32>
    %13 = vector.broadcast %11 : vector<1x256xf32> to vector<8x256xf32>
    %14 = arith.mulf %13, %12 : vector<8x256xf32>
    %15 = vector.extract_strided_slice %14 {offsets = [0, 0], sizes = [8, 128], strides = [1, 1]} : vector<8x256xf32> to vector<8x128xf32>
    %16 = vector.extract_strided_slice %14 {offsets = [0, 128], sizes = [8, 128], strides = [1, 1]} : vector<8x256xf32> to vector<8x128xf32>
    %17 = arith.addf %15, %16 : vector<8x128xf32>
    %c0_9 = arith.constant 0 : index
    %c0_10 = arith.constant 0 : index
    %18 = vector.load %arg5[%c0_9, %c0_10] : memref<1x128xf32, #tpu.memory_space<vmem>>, vector<1x128xf32>
    %19 = vector.broadcast %18 : vector<1x128xf32> to vector<8x128xf32>
    %20 = arith.addf %17, %19 : vector<8x128xf32>
    %c0_11 = arith.constant 0 : index
    %c0_12 = arith.constant 0 : index
    %21 = vector.load %arg6[%c0_11, %c0_12] : memref<8x128xf32, #tpu.memory_space<vmem>>, vector<8x128xf32>
    tpu.vector_store %arg6[%c0_11, %c0_12], %20 {strides = array<i32>} : memref<8x128xf32, #tpu.memory_space<vmem>>, vector<8x128xf32>,
    return
  }
  func.func @transform_0(%arg0: i32) -> (i32, i32) {
    %c0_i32 = arith.constant 0 : i32
    %c0_i32_0 = arith.constant 0 : i32
    return %arg0, %c0_i32 : i32, i32
  }
  func.func @transform_1(%arg0: i32) -> (i32, i32) {
    %c0_i32 = arith.constant 0 : i32
    %c0_i32_0 = arith.constant 0 : i32
    %c0_i32_1 = arith.constant 0 : i32
    return %c0_i32, %c0_i32_0 : i32, i32
  }
  func.func @transform_2(%arg0: i32) -> (i32, i32) {
    %c0_i32 = arith.constant 0 : i32
    %c0_i32_0 = arith.constant 0 : i32
    %c0_i32_1 = arith.constant 0 : i32
    return %c0_i32, %c0_i32_0 : i32, i32
  }
  func.func @transform_3(%arg0: i32) -> (i32, i32) {
    %c0_i32 = arith.constant 0 : i32
    %c0_i32_0 = arith.constant 0 : i32
    %c0_i32_1 = arith.constant 0 : i32
    return %c0_i32, %c0_i32_0 : i32, i32
  }
  func.func @transform_4(%arg0: i32) -> (i32, i32) {
    %c0_i32 = arith.constant 0 : i32
    %c0_i32_0 = arith.constant 0 : i32
    %c0_i32_1 = arith.constant 0 : i32
    return %c0_i32, %c0_i32_0 : i32, i32
  }
  func.func @transform_5(%arg0: i32) -> (i32, i32) {
    %c0_i32 = arith.constant 0 : i32
    %c0_i32_0 = arith.constant 0 : i32
    return %arg0, %c0_i32 : i32, i32
  }
}

</mosaic_0001>

<bundles_post_ra>
// kernel: tpu_custom_call.1
= control target key start
LH: loop header
LB: loop body
LE: loop exit
PB: predicated region body
PF: predicated region fallthrough
CT: control target
= control target key end

     0   :  { %10 = vsyncpa [#allocation3], 0  ;;  %s970_s0 = inlined_call_operand.hbm [shape: f32[16,64], index: 0, kind: input, shape index: {}]   ;;  %s971_s1 = inlined_call_operand.hbm [shape: f32[64,512], index: 1, kind: input, shape index: {}]   ;;  %s972_s2 = inlined_call_operand.hbm [shape: f32[1,256], index: 2, kind: input, shape index: {}]   ;;  %s973_s3 = inlined_call_operand.vmem [shape: f32[1,256], index: 3, kind: input, shape index: {}]   ;;  %s974_s4 = inlined_call_operand.vmem [shape: f32[1,128], index: 4, kind: input, shape index: {}]   ;;  %s975_s5 = inlined_call_operand.hbm [shape: f32[16,128], index: 5, kind: output, shape index: {}]  }
   0x1   :  { %12 = vsyncpa [#allocation3 + $0x1], 0 }
   0x2   :  { %13 = vsyncpa [#allocation6], 0 }
   0x3   :  { %14 = vsyncpa [#allocation4], 0 }
   0x4   :  { %16 = vsyncpa [#allocation4 + $0x1], 0  ;;  %s808_s18 = smov 0   ;;  %s810_s19 = smov 0  }
   0x5   :  { %s812_s20 = smov 0   ;;  %s814_s21 = smov 0  }
   0x6 LB: > { %s174_s24 = sshll.u32 %s971_s1, 4  ;;  %s832_s25 = sadd.s32 4294967295, %s772_s21   ;;  %s772_s21 = sphi %s814_s21, %s986_s21   ;;  %s768_s20 = sphi %s812_s20, %s985_s20   ;;  %s764_s19 = sphi %s810_s19, %s984_s19   ;;  %s760_s18 = sphi %s808_s18, %s983_s18   ;;  %s175_s24 = int_to_ptr.hbm [resolvable:$true] %s174_s24 }
   0x7   : > { %p523_p0 = scmp.ge.s32.totalorder %s772_s21, 1  ;;  %p43_p1 = scmp.eq.s32.totalorder %s832_s25, 0 }
   0x8   : > { %p163_p2 = scmp.lt.s32.totalorder %s772_s21, 3  ;;  %s774_s27 = smov [#allocation5]  }
   0x9   : > { %s176_s28 = sshll.u32 %s774_s27, 4  ;;  %s189_s6 = sshll.u32 %s972_s2, 4  ;;  %s177_s28 = int_to_ptr.vmem [resolvable:$true] %s176_s28  ;;  %s190_s6 = int_to_ptr.hbm [resolvable:$true] %s189_s6 }
   0xa   : > { %p837_p3 = pnand %p523_p0, %p163_p2  ;;  %s775_s7 = smov [#allocation7]  }
   0xb   : > { %s191_s8 = sshll.u32 %s775_s7, 4  ;;  %s776_s9 = smov 512   ;;  %s192_s8 = int_to_ptr.vmem [resolvable:$true] %s191_s8 }
   0xc   : > { %p554_p4 = pneg %p837_p3  ;;  %s777_s10 = smov 32  }
   0xd   : > { %s522_s11 = sadd.s32 4294967294, %s772_s21   ;;  %s851_s12 = sadd.s32 1, %s772_s21  }
   0xe   : > { %p555_p6 = pnand %p554_p4, %p43_p1  ;;  %s26_s13 = ssub.s32 %s772_s21, %s851_s12 }
   0xf   : > { %s29_s14 = sadd.s32 1, %s768_s20  ;;  %p27_p7 = scmp.eq.s32.totalorder %s26_s13, 0 }
  0x10   : > { %557 = dma.hbm_to_vmem [thread:$0]  (!%p555_p6), %s175_s24, 4096, %s177_s28, [#allocation6], %s776_s9, %s776_s9, %s777_s10  }
  0x11   : > { %560 = dma.hbm_to_vmem [thread:$0]  (!%p555_p6), %s190_s6, 32, %s192_s8, [#allocation6]  }
  0x12   : > { %p36_p8 = scmp.ne.s32.totalorder %s768_s20, %s764_s19  ;;  %p37_p9 = scmp.eq.s32.totalorder %s772_s21, 0 }
  0x13   : > { %p42_p10 = scmp.ne.s32.totalorder %s764_s19, %s760_s18  ;;  %p150_p13 = scmp.eq.s32.totalorder %s832_s25, 1 }
  0x14   : > { %s862_s15 = scalar_select %p27_p7, %s768_s20, %s29_s14  }
  0x15   : > { %p864_p11 = por %p37_p9, %p36_p8  ;;  %p870_p12 = por %p43_p1, %p42_p10 }
  0x16   : > { %p156_p0 = scmp.eq.s32.totalorder %s522_s11, 1  ;;  %p571_p2 = scmp.lt.s32.totalorder %s772_s21, 2 }
  0x17   : > { %s208_s22 = sand.u32 1, %s768_s20   ;;  %p877_p4 = por %p150_p13, %p36_p8 }
  0x18   : > { %p881_p6 = por %p156_p0, %p42_p10  ;;  %s527_s27 = sshll.u32 %s208_s22, 3 }
  0x19   : > { %s528_s28 = sshll.u32 %s772_s21, 3  ;;  %s212_s7 = scalar_lea.vmem [#allocation2], %s527_s27 }
  0x1a   : > { %s216_s6 = scalar_lea.hbm %s970_s0, %s528_s28  ;;  %s220_s8 = sshll.u32 %s212_s7, 4  ;;  %s221_s8 = int_to_ptr.vmem [resolvable:$true] %s220_s8 }
  0x1b   : > { %s218_s9 = sshll.u32 %s216_s6, 4  ;;  %p891_p7 = pnand %p571_p2, %p864_p11  ;;  %s219_s9 = int_to_ptr.hbm [resolvable:$true] %s218_s9 }
  0x1c   : > { %s209_s11 = scalar_lea.sflag [#allocation3], %s208_s22  ;;  %s672_s13 = sshra.s32 %s219_s9, 4  ;;  %s673_s13 = int_to_ptr.hbm [resolvable:$true] %s672_s13 }
  0x1d   : > { %s674_s14 = scalar_lea.hbm %s673_s13, 8  ;;  %p676_p9 = pneg %p891_p7 }
  0x1e   : > { %p675_p8 = scmp.ne.s32.totalorder %s673_s13, %s674_s14  ;;  %s679_s29 = scalar_lea.hbm %s970_s0, 16 }
  0x1f   : > { %p680_p11 = scmp.lt.s32.totalorder %s673_s13, %s970_s0  ;;  %p681_p0 = scmp.lt.s32.totalorder %s679_s29, %s674_s14 }
  0x20   : > { %p677_p10 = pnand %p676_p9, %p675_p8 }
  0x21   : > { %p682_p2 = por %p681_p0, %p680_p11 }
  0x22   : > { %p678_p13 = pneg %p677_p10 }
  0x24   : > { %p683_p5 = pnand %p682_p2, %p678_p13 }
  0x26   : > { %686 = shalt.err (!%p683_p5)
}
  0x27   : > { %564 = dma.hbm_to_vmem [thread:$0]  (!%p891_p7), %s219_s9, 128, %s221_s8, %s209_s11  }
  0x28   : > { %229 = sbr.rel (%p837_p3) target bundleno = 209 (0xd1), region = 40  ;;  %s908_s22 = sand.u32 (!%p837_p3), 1, %s764_s19  }
  0x29   : > { %s530_s6 = sshll.u32 (!%p837_p3), %s908_s22, 3  ;;  %s232_s7 = scalar_lea.sflag (!%p837_p3), [#allocation3], %s908_s22 }
  0x2a   : > { %s914_s13 = scalar_lea.vmem (!%p837_p3), [#allocation2], %s530_s6 }
  0x2d   : > { %747 = dma.done.wait (%p870_p12), %s232_s7, 128  }
  0x2e   : > { %749 = vsyncadd (%p870_p12), %s232_s7, 4294967168 }
  0x2f   : > { %751 = dma.done.wait (%p43_p1), [#allocation6], 4128  }
  0x30   : > { %753 = vsyncadd (%p43_p1), [#allocation6], 4294963168  ;;  %v304_v0 = vld [vmem:[#allocation5 + $0xf0] sm:$0xff]  ;;  %v305_v1 = vld [vmem:[#allocation5 + $0xf8] sm:$0xff]  ;;  %vm306_vm0 = vcmask 523264   ;;  %s539_s8 = sshll.u32 %s832_s25, 3 }
  0x31   : > { %v300_v2 = vld [vmem:[#allocation5 + $0xd0] sm:$0xff]  ;;  %358 = vmatpush.msra.mxu2 %v304_v0  ;;  %378 = vmatpush.msra.mxu3 %v305_v1  ;;  %v301_v3 = vld [vmem:[#allocation5 + $0xd8] sm:$0xff]  ;;  %v302_v6 = vld [vmem:[#allocation5 + $0xe0] sm:$0xff]  ;;  %s428_s11 = scalar_lea.hbm %s975_s5, %s539_s8  ;;  %s272_s25 = scalar_lea.vmem [#allocation8], %s530_s6 }
  0x32   : > { %v296_v4 = vld [vmem:[#allocation5 + $0xb0] sm:$0xff]  ;;  %v297_v5 = vld [vmem:[#allocation5 + $0xb8] sm:$0xff]  ;;  %v303_v7 = vld [vmem:[#allocation5 + $0xe8] sm:$0xff]  ;;  %318 = vmatpush.msra.mxu0 %v302_v6  ;;  %s430_s28 = sshll.u32 %s272_s25, 4  ;;  %s432_s29 = sshll.u32 %s428_s11, 4  ;;  %s431_s28 = int_to_ptr.vmem [resolvable:$true] %s430_s28  ;;  %s433_s29 = int_to_ptr.hbm [resolvable:$true] %s432_s29 }
  0x33   : > { %359 = vmatpush.msra.mxu2 %v300_v2  ;;  %379 = vmatpush.msra.mxu3 %v301_v3  ;;  %v298_v8 = vld [vmem:[#allocation5 + $0xc0] sm:$0xff]  ;;  %v299_v9 = vld [vmem:[#allocation5 + $0xc8] sm:$0xff]  ;;  %v292_v10 = vld [vmem:[#allocation5 + $0x90] sm:$0xff]  ;;  %s418_s30 = scalar_lea.sflag [#allocation4], %s908_s22  ;;  %s716_s16 = sshra.s32 %s433_s29, 4  ;;  %s717_s16 = int_to_ptr.hbm [resolvable:$true] %s716_s16 }
  0x34   : > { %338 = vmatpush.msra.mxu1 %v303_v7  ;;  %v293_v11 = vld [vmem:[#allocation5 + $0x98] sm:$0xff]  ;;  %v294_v12 = vld [vmem:[#allocation5 + $0xa0] sm:$0xff]  ;;  %v295_v13 = vld [vmem:[#allocation5 + $0xa8] sm:$0xff]  ;;  %319 = vmatpush.msra.mxu0 %v298_v8  ;;  %s718_s7 = scalar_lea.hbm %s717_s16, 8  ;;  %s722_s17 = scalar_lea.hbm %s975_s5, 16 }
  0x35   : > { %360 = vmatpush.msra.mxu2 %v296_v4  ;;  %380 = vmatpush.msra.mxu3 %v297_v5  ;;  %v288_v14 = vld [vmem:[#allocation5 + $0x70] sm:$0xff]  ;;  %v289_v15 = vld [vmem:[#allocation5 + $0x78] sm:$0xff]  ;;  %v290_v16 = vld [vmem:[#allocation5 + $0x80] sm:$0xff]  ;;  %p719_p1 = scmp.ne.s32.totalorder %s717_s16, %s718_s7  ;;  %p723_p12 = scmp.lt.s32.totalorder %s717_s16, %s975_s5 }
  0x36   : > { %339 = vmatpush.msra.mxu1 %v299_v9  ;;  %v291_v17 = vld [vmem:[#allocation5 + $0x88] sm:$0xff]  ;;  %320 = vmatpush.msra.mxu0 %v294_v12  ;;  %v284_v18 = vld [vmem:[#allocation5 + $0x50] sm:$0xff]  ;;  %v285_v19 = vld [vmem:[#allocation5 + $0x58] sm:$0xff]  ;;  %p724_p7 = scmp.lt.s32.totalorder %s722_s17, %s718_s7 }
  0x37   : > { %361 = vmatpush.msra.mxu2 %v292_v10  ;;  %381 = vmatpush.msra.mxu3 %v293_v11  ;;  %v286_v20 = vld [vmem:[#allocation5 + $0x60] sm:$0xff]  ;;  %v287_v21 = vld [vmem:[#allocation5 + $0x68] sm:$0xff]  ;;  %v280_v22 = vld [vmem:[#allocation5 + $0x30] sm:$0xff]  ;;  %p720_p3 = pnand %p719_p1, %p877_p4 }
  0x38   : > { %340 = vmatpush.msra.mxu1 %v295_v13  ;;  %321 = vmatpush.msra.mxu0 %v290_v16  ;;  %v281_v23 = vld [vmem:[#allocation5 + $0x38] sm:$0xff]  ;;  %v282_v24 = vld [vmem:[#allocation5 + $0x40] sm:$0xff]  ;;  %v283_v25 = vld [vmem:[#allocation5 + $0x48] sm:$0xff]  ;;  %p725_p8 = por %p724_p7, %p723_p12 }
  0x39   : > { %362 = vmatpush.msra.mxu2 %v288_v14  ;;  %382 = vmatpush.msra.mxu3 %v289_v15  ;;  %v276_v26 = vld [vmem:[#allocation5 + $0x10] sm:$0xff]  ;;  %v277_v27 = vld [vmem:[#allocation5 + $0x18] sm:$0xff]  ;;  %v278_v29 = vld [vmem:[#allocation5 + $0x20] sm:$0xff]  ;;  %p721_p5 = pneg %p720_p3 }
  0x3a   : > { %341 = vmatpush.msra.mxu1 %v291_v17  ;;  %322 = vmatpush.msra.mxu0 %v286_v20  ;;  %v273_v28 = vld [vmem:[%s914_s13] sm:$0xff]  ;;  %v279_v30 = vld [vmem:[#allocation5 + $0x28] sm:$0xff]  ;;  %v274_v31 = vld [vmem:[#allocation5] sm:$0xff] }
  0x3b   : > { %363 = vmatpush.msra.mxu2 %v284_v18  ;;  %383 = vmatpush.msra.mxu3 %v285_v19  ;;  %v275_v32 = vld [vmem:[#allocation5 + $0x8] sm:$0xff]  ;;  %v390_v33 = vld [vmem:[#allocation7] sm:$0x3]  ;;  %v400_v38 = vld [vmem:[%s973_s3] sm:$0x3]  ;;  %p726_p9 = pnand %p725_p8, %p721_p5 }
  0x3c   : > { %342 = vmatpush.msra.mxu1 %v287_v21  ;;  %323 = vmatpush.msra.mxu0 %v282_v24  ;;  %v392_v34 = vperm.slane %v390_v33, 0  ;;  %v393_v35 = vperm.slane %v390_v33, 1  ;;  %v404_v44 = vperm.slane %v400_v38, 0  ;;  %v405_v46 = vperm.slane %v400_v38, 1  ;;  %v611_v51 = vld [vmem:[%s974_s4] ss:$0 sm:$0xff] }
  0x3d   : > { %364 = vmatpush.msra.mxu2 %v280_v22  ;;  %384 = vmatpush.msra.mxu3 %v281_v23 }
  0x3e   : > { %343 = vmatpush.msra.mxu1 %v283_v25  ;;  %324 = vmatpush.msra.mxu0 %v278_v29 }
  0x3f   : > { %365 = vmatpush.msra.mxu2 %v276_v26  ;;  %385 = vmatpush.msra.mxu3 %v277_v27 }
  0x40   : > { %536 = vmatmul.msk.f32.vlgmr.msra.gmra.mxu2 %vm306_vm0, %v273_v28  ;;  %537 = vmatmul.msk.f32.vlgmr.msra.gmra.mxu3 %vm306_vm0, %v273_v28 }
  0x41   : > { %344 = vmatpush.msra.mxu1 %v279_v30  ;;  %325 = vmatpush.msra.mxu0 %v274_v31 }
  0x42   : > { %534 = vmatmul.msk.f32.vlgmr.msra.gmra.mxu0 %vm306_vm0, %v273_v28 }
  0x43   : > { %345 = vmatpush.msra.mxu1 %v275_v32 }
  0x44   : > { %535 = vmatmul.msk.f32.vlgmr.msra.gmra.mxu1 %vm306_vm0, %v273_v28 }
  0xbf   : > { %v327_v36 = vpop.f32.mrf.mxu0 }
  0xc0   : > { %v396_v39 = vsub.f32 %v327_v36, %v392_v34 }
  0xc1   : > { %v347_v37 = vpop.f32.mrf.mxu1 }
  0xc2   : > { %v397_v40 = vsub.f32 %v347_v37, %v393_v35 }
  0xc3   : > { %v367_v41 = vpop.f32.mrf.mxu2  ;;  %v387_v42 = vpop.f32.mrf.mxu3 }
  0xc4   : > { %v398_v43 = vsub.f32 %v367_v41, %v392_v34  ;;  %v399_v45 = vsub.f32 %v387_v42, %v393_v35 }
  0xc6   : > { %v401_v47 = vmul.f32 %v398_v43, %v396_v39  ;;  %v402_v48 = vmul.f32 %v399_v45, %v397_v40 }
  0xc8   : > { %v408_v49 = vmul.f32 %v404_v44, %v401_v47  ;;  %v409_v50 = vmul.f32 %v405_v46, %v402_v48 }
  0xca   : > { %v410_v52 = vadd.f32 %v409_v50, %v408_v49 }
  0xcc   : > { %v415_v53 = vadd.f32 %v611_v51, %v410_v52 }
  0xce   : > { %416 = vst [vmem:[%s272_s25] sm:$0xff] %v415_v53 }
  0xcf   : > { %729 = shalt.err (!%p726_p9)
}
  0xd0   : > { %552 = dma.vmem_to_hbm [thread:$0]  (%p877_p4), %s431_s28, 128, %s433_s29, %s418_s30  }
  0xd1 PF: > { %s444_s22 = sand.u32 1, %s760_s18   ;;  %p982_p10 = scmp.ge.s32.totalorder %s772_s21, 2 }
  0xd2   : > { %s445_s9 = scalar_lea.sflag [#allocation4], %s444_s22 }
  0xd3   : > { %p566_p13 = pnand %p982_p10, %p881_p6 }
  0xd5   : > { %p567_p11 = pneg %p566_p13 }
  0xd7   : > { %755 = dma.done.wait (%p567_p11), %s445_s9, 128  }
  0xd8   : > { %757 = vsyncadd (%p567_p11), %s445_s9, 4294967168  ;;  %p19_p0 = scmp.ge.s32.totalorder %s851_s12, 4   ;;  %s983_s18 = smov %s764_s19 }
  0xd9   : > { %s984_s19 = smov %s768_s20  ;;  %s985_s20 = smov %s862_s15 }
  0xda   : > { %s986_s21 = smov %s851_s12  ;;  %21 = sbr.rel (!%p19_p0) target bundleno = 6 (0x6), region = 93 }
  0xdf   :  { %451 = vsyncpa [#allocation3], 1 }
  0xe0   :  { %453 = vsyncpa [#allocation3 + $0x1], 1 }
  0xe1   :  { %454 = vsyncpa [#allocation6], 1 }
  0xe2   :  { %455 = vsyncpa [#allocation4], 1 }
  0xe3   :  { %457 = vsyncpa [#allocation4 + $0x1], 1 }

</bundles_post_ra>
